<compile_context>
chip_gen: v7x
topology: tpu7x:2x2x1
jax: 0.10.0
libtpu: 0.0.40
codegen_flags: <defaults>
</compile_context>

<pallas_src>
import jax
import jax.numpy as jnp
from jax import lax
from jax.experimental import pallas as pl
from jax.experimental.pallas import tpu as pltpu

G = 16                      # canvas size (G x G)
PIX = G * G                 # 256 pixels, lane-dense (2 x 128 lanes)
NUM_STROKES = 10            # as in random_params()
NUM_POINTS = 5              # points per stroke
NUM_SEGS = NUM_POINTS - 1   # 4 segments per stroke

# Row layout of the packed parameter array: (N_ROWS, NUM_STROKES, 1) f32
ROW_VX = 0                            # rows 0..3   : segment start x (per seg)
ROW_VY = ROW_VX + NUM_SEGS            # rows 4..7   : segment start y
ROW_DX = ROW_VY + NUM_SEGS            # rows 8..11  : segment delta x (w - v)
ROW_DY = ROW_DX + NUM_SEGS            # rows 12..15 : segment delta y
ROW_INVD2 = ROW_DY + NUM_SEGS         # rows 16..19 : 1 / (|w-v|^2 + 1e-5)
ROW_INV2TSQ = ROW_INVD2 + NUM_SEGS    # row  20     : 1 / (2t)^2
ROW_COL = ROW_INV2TSQ + 1             # rows 21..23 : clamped colors r, g, b
N_ROWS = ROW_COL + 3                  # 24


def renderer_kernel(params_ref, out_ref):
    # params_ref: (N_ROWS, S, 1) f32  -- all per-segment/per-stroke scalars
    # out_ref   : (3, PIX) f32        -- flattened CHW canvas, written once
    f32 = jnp.float32

    # Pixel coordinates generated in-kernel (no DMA). Flattened pixel p maps to
    # (x, y) = (p // G, p % G), matching meshgrid(..., indexing='ij').
    pix = lax.broadcasted_iota(jnp.int32, (1, PIX), 1).astype(f32)   # (1, PIX)
    xs = jnp.floor(pix * (1.0 / G))            # exact: G is a power of two
    ys = pix - xs * G

    inv_two_t_sq = params_ref[ROW_INV2TSQ]     # (S, 1)

    # Running max over the 4 segments of each stroke; darkness >= 0 so a zero
    # init is equivalent to the reference's max over the segment axis.
    dark = jnp.zeros((NUM_STROKES, PIX), f32)
    for k in range(NUM_SEGS):                  # 4-way unrolled segment loop
        vx = params_ref[ROW_VX + k]            # (S, 1)
        vy = params_ref[ROW_VY + k]
        dx = params_ref[ROW_DX + k]
        dy = params_ref[ROW_DY + k]
        inv_d2 = params_ref[ROW_INVD2 + k]

        relx = xs - vx                         # (S, PIX)
        rely = ys - vy
        tt = jnp.clip((relx * dx + rely * dy) * inv_d2, 0.0, 1.0)
        ex = relx - tt * dx                    # p - proj, x
        ey = rely - tt * dy                    # p - proj, y
        d2 = ex * ex + ey * ey
        # (2t - d)/(2t) == 1 - sqrt(d^2 / (2t)^2); sqrt runs on the EUP slot.
        dk = jnp.clip(1.0 - jnp.sqrt(d2 * inv_two_t_sq), 0.0, 1.0)
        dark = jnp.maximum(dark, dk)

    # Colored max-composite over strokes; single unmasked lane-dense store.
    col = params_ref[pl.ds(ROW_COL, 3)]        # (3, S, 1)
    out_ref[...] = jnp.max(col * dark[None, :, :], axis=1)   # (3, PIX)


@jax.jit
def straight_renderer(strokes, thicknesses, colors):
    """strokes: (S, 5, 2) f32; thicknesses: (S,) f32; colors: (S, 3) f32."""
    f32 = jnp.float32
    s = jnp.clip(strokes.astype(f32), 0.0, 1.0) * float(G)      # (S, 5, 2)
    v = s[:, :-1, :]                                             # (S, 4, 2)
    w = s[:, 1:, :]                                              # (S, 4, 2)
    d = w - v

    # Segment-major (SEGS, S) rows.
    vx = jnp.transpose(v[..., 0])
    vy = jnp.transpose(v[..., 1])
    dx = jnp.transpose(d[..., 0])
    dy = jnp.transpose(d[..., 1])
    inv_d2 = 1.0 / (dx * dx + dy * dy + 1e-5)

    t = jnp.maximum(thicknesses.astype(f32) * 2.0 + 0.5, 0.5)    # (S,)
    two_t = 2.0 * t
    inv_two_t_sq = (1.0 / (two_t * two_t))[None, :]              # (1, S)

    col_t = jnp.transpose(jnp.clip(colors.astype(f32), 0.0, 1.0))  # (3, S)

    # Single packed parameter array -> one HBM->VMEM DMA.
    packed = jnp.concatenate(
        [vx, vy, dx, dy, inv_d2, inv_two_t_sq, col_t], axis=0    # (24, S)
    ).astype(f32)[:, :, None]                                    # (24, S, 1)

    vmem = pl.BlockSpec(memory_space=pltpu.MemorySpace.VMEM)
    out_flat = pl.pallas_call(
        renderer_kernel,
        out_shape=jax.ShapeDtypeStruct((3, PIX), jnp.float32),
        in_specs=[vmem],
        out_specs=vmem,
    )(packed)
    return out_flat.reshape(3, G, G)


def reference(strokes, thicknesses, colors):
    """Pure-JAX transcription of the PyTorch forward for validation."""
    s = jnp.clip(strokes, 0.0, 1.0) * float(G)
    v = s[:, :-1, None, None, :]                           # (S,4,1,1,2)
    w = s[:, 1:, None, None, :]                            # (S,4,1,1,2)
    idx = jnp.arange(G, dtype=jnp.float32)
    xs, ys = jnp.meshgrid(idx, idx, indexing="ij")
    p = jnp.stack([xs, ys], axis=-1)[None, None]           # (1,1,G,G,2)
    d2 = jnp.sum((w - v) ** 2, axis=-1)
    dot = jnp.sum((p - v) * (w - v), axis=-1) / (d2 + 1e-5)
    tt = jnp.clip(dot, 0.0, 1.0)[..., None]
    proj = v + tt * (w - v)
    dist = jnp.sqrt(jnp.sum((p - proj) ** 2, axis=-1))     # (S,4,G,G)
    t = jnp.maximum(thicknesses * 2.0 + 0.5, 0.5)[:, None, None, None]
    dark = jnp.clip((2.0 * t - dist) / (2.0 * t), 0.0, 1.0)
    dark = jnp.max(dark, axis=1)                           # (S,G,G)
    col = jnp.clip(colors, 0.0, 1.0)
    colored = dark[:, None, :, :] * col[:, :, None, None]  # (S,3,G,G)
    return jnp.max(colored, axis=0)                        # (3,G,G)


if __name__ == "__main__":
    key = jax.random.PRNGKey(0)
    k1, k2, k3 = jax.random.split(key, 3)
    # params equivalent to random_params(): 10 strokes (5,2), 10 thicknesses, 10 colors
    strokes = jax.random.uniform(k1, (NUM_STROKES, NUM_POINTS, 2), dtype=jnp.float32)
    thicknesses = jax.random.uniform(k2, (NUM_STROKES,), dtype=jnp.float32)
    colors = jax.random.uniform(k3, (NUM_STROKES, 3), dtype=jnp.float32)

    out = jax.block_until_ready(straight_renderer(strokes, thicknesses, colors))
    ref = reference(strokes, thicknesses, colors)

    assert out.shape == (3, G, G) and out.dtype == jnp.float32
    assert jnp.allclose(out, ref, atol=1e-5, rtol=1e-5), float(jnp.max(jnp.abs(out - ref)))

    print("KERNEL_OK")
</pallas_src>

<mosaic_0001>
module attributes {stable_mosaic.version = 11 : i64} {
  func.func @renderer_kernel(%arg0: memref<24x10x1xf32, #tpu.memory_space<vmem>>, %arg1: memref<3x256xf32, #tpu.memory_space<vmem>>) attributes {dimension_semantics = [], scalar_prefetch = 0 : i64, scratch_operands = 0 : i64, tpu.core_type = #tpu.core_type<tc>} {
    %0 = tpu.iota {dimensions = array<i32: 1>} : vector<1x256xi32>
    %1 = arith.sitofp %0 : vector<1x256xi32> to vector<1x256xf32>
    %cst = arith.constant 6.250000e-02 : f32
    %2 = vector.broadcast %cst : f32 to vector<1x256xf32>
    %3 = arith.mulf %1, %2 : vector<1x256xf32>
    %4 = math.floor %3 : vector<1x256xf32>
    %cst_0 = arith.constant 1.600000e+01 : f32
    %5 = vector.broadcast %cst_0 : f32 to vector<1x256xf32>
    %6 = arith.mulf %4, %5 : vector<1x256xf32>
    %7 = arith.subf %1, %6 : vector<1x256xf32>
    %c20 = arith.constant 20 : index
    %c0 = arith.constant 0 : index
    %c0_1 = arith.constant 0 : index
    %8 = vector.load %arg0[%c20, %c0, %c0_1] : memref<24x10x1xf32, #tpu.memory_space<vmem>>, vector<1x10x1xf32>
    %9 = vector.shape_cast %8 : vector<1x10x1xf32> to vector<10x1xf32>
    %cst_2 = arith.constant 0.000000e+00 : f32
    %10 = vector.broadcast %cst_2 : f32 to vector<10x256xf32>
    %c0_3 = arith.constant 0 : index
    %c0_4 = arith.constant 0 : index
    %c0_5 = arith.constant 0 : index
    %11 = vector.load %arg0[%c0_3, %c0_4, %c0_5] : memref<24x10x1xf32, #tpu.memory_space<vmem>>, vector<1x10x1xf32>
    %12 = vector.shape_cast %11 : vector<1x10x1xf32> to vector<10x1xf32>
    %c4 = arith.constant 4 : index
    %c0_6 = arith.constant 0 : index
    %c0_7 = arith.constant 0 : index
    %13 = vector.load %arg0[%c4, %c0_6, %c0_7] : memref<24x10x1xf32, #tpu.memory_space<vmem>>, vector<1x10x1xf32>
    %14 = vector.shape_cast %13 : vector<1x10x1xf32> to vector<10x1xf32>
    %c8 = arith.constant 8 : index
    %c0_8 = arith.constant 0 : index
    %c0_9 = arith.constant 0 : index
    %15 = vector.load %arg0[%c8, %c0_8, %c0_9] : memref<24x10x1xf32, #tpu.memory_space<vmem>>, vector<1x10x1xf32>
    %16 = vector.shape_cast %15 : vector<1x10x1xf32> to vector<10x1xf32>
    %c12 = arith.constant 12 : index
    %c0_10 = arith.constant 0 : index
    %c0_11 = arith.constant 0 : index
    %17 = vector.load %arg0[%c12, %c0_10, %c0_11] : memref<24x10x1xf32, #tpu.memory_space<vmem>>, vector<1x10x1xf32>
    %18 = vector.shape_cast %17 : vector<1x10x1xf32> to vector<10x1xf32>
    %c16 = arith.constant 16 : index
    %c0_12 = arith.constant 0 : index
    %c0_13 = arith.constant 0 : index
    %19 = vector.load %arg0[%c16, %c0_12, %c0_13] : memref<24x10x1xf32, #tpu.memory_space<vmem>>, vector<1x10x1xf32>
    %20 = vector.shape_cast %19 : vector<1x10x1xf32> to vector<10x1xf32>
    %21 = vector.broadcast %4 : vector<1x256xf32> to vector<10x256xf32>
    %22 = vector.broadcast %12 : vector<10x1xf32> to vector<10x256xf32>
    %23 = arith.subf %21, %22 : vector<10x256xf32>
    %24 = vector.broadcast %7 : vector<1x256xf32> to vector<10x256xf32>
    %25 = vector.broadcast %14 : vector<10x1xf32> to vector<10x256xf32>
    %26 = arith.subf %24, %25 : vector<10x256xf32>
    %27 = vector.broadcast %16 : vector<10x1xf32> to vector<10x256xf32>
    %28 = arith.mulf %23, %27 : vector<10x256xf32>
    %29 = vector.broadcast %18 : vector<10x1xf32> to vector<10x256xf32>
    %30 = arith.mulf %26, %29 : vector<10x256xf32>
    %31 = arith.addf %28, %30 : vector<10x256xf32>
    %32 = vector.broadcast %20 : vector<10x1xf32> to vector<10x256xf32>
    %33 = arith.mulf %31, %32 : vector<10x256xf32>
    %cst_14 = arith.constant 0.000000e+00 : f32
    %cst_15 = arith.constant 1.000000e+00 : f32
    %34 = vector.broadcast %cst_14 : f32 to vector<10x256xf32>
    %35 = arith.maximumf %34, %33 : vector<10x256xf32>
    %36 = vector.broadcast %cst_15 : f32 to vector<10x256xf32>
    %37 = arith.minimumf %36, %35 : vector<10x256xf32>
    %38 = vector.broadcast %16 : vector<10x1xf32> to vector<10x256xf32>
    %39 = arith.mulf %37, %38 : vector<10x256xf32>
    %40 = arith.subf %23, %39 : vector<10x256xf32>
    %41 = vector.broadcast %18 : vector<10x1xf32> to vector<10x256xf32>
    %42 = arith.mulf %37, %41 : vector<10x256xf32>
    %43 = arith.subf %26, %42 : vector<10x256xf32>
    %44 = arith.mulf %40, %40 : vector<10x256xf32>
    %45 = arith.mulf %43, %43 : vector<10x256xf32>
    %46 = arith.addf %44, %45 : vector<10x256xf32>
    %47 = vector.broadcast %9 : vector<10x1xf32> to vector<10x256xf32>
    %48 = arith.mulf %46, %47 : vector<10x256xf32>
    %49 = math.sqrt %48 : vector<10x256xf32>
    %cst_16 = arith.constant 1.000000e+00 : f32
    %50 = vector.broadcast %cst_16 : f32 to vector<10x256xf32>
    %51 = arith.subf %50, %49 : vector<10x256xf32>
    %cst_17 = arith.constant 0.000000e+00 : f32
    %cst_18 = arith.constant 1.000000e+00 : f32
    %52 = vector.broadcast %cst_17 : f32 to vector<10x256xf32>
    %53 = arith.maximumf %52, %51 : vector<10x256xf32>
    %54 = vector.broadcast %cst_18 : f32 to vector<10x256xf32>
    %55 = arith.minimumf %54, %53 : vector<10x256xf32>
    %56 = arith.maximumf %10, %55 : vector<10x256xf32>
    %c1 = arith.constant 1 : index
    %c0_19 = arith.constant 0 : index
    %c0_20 = arith.constant 0 : index
    %57 = vector.load %arg0[%c1, %c0_19, %c0_20] : memref<24x10x1xf32, #tpu.memory_space<vmem>>, vector<1x10x1xf32>
    %58 = vector.shape_cast %57 : vector<1x10x1xf32> to vector<10x1xf32>
    %c5 = arith.constant 5 : index
    %c0_21 = arith.constant 0 : index
    %c0_22 = arith.constant 0 : index
    %59 = vector.load %arg0[%c5, %c0_21, %c0_22] : memref<24x10x1xf32, #tpu.memory_space<vmem>>, vector<1x10x1xf32>
    %60 = vector.shape_cast %59 : vector<1x10x1xf32> to vector<10x1xf32>
    %c9 = arith.constant 9 : index
    %c0_23 = arith.constant 0 : index
    %c0_24 = arith.constant 0 : index
    %61 = vector.load %arg0[%c9, %c0_23, %c0_24] : memref<24x10x1xf32, #tpu.memory_space<vmem>>, vector<1x10x1xf32>
    %62 = vector.shape_cast %61 : vector<1x10x1xf32> to vector<10x1xf32>
    %c13 = arith.constant 13 : index
    %c0_25 = arith.constant 0 : index
    %c0_26 = arith.constant 0 : index
    %63 = vector.load %arg0[%c13, %c0_25, %c0_26] : memref<24x10x1xf32, #tpu.memory_space<vmem>>, vector<1x10x1xf32>
    %64 = vector.shape_cast %63 : vector<1x10x1xf32> to vector<10x1xf32>
    %c17 = arith.constant 17 : index
    %c0_27 = arith.constant 0 : index
    %c0_28 = arith.constant 0 : index
    %65 = vector.load %arg0[%c17, %c0_27, %c0_28] : memref<24x10x1xf32, #tpu.memory_space<vmem>>, vector<1x10x1xf32>
    %66 = vector.shape_cast %65 : vector<1x10x1xf32> to vector<10x1xf32>
    %67 = vector.broadcast %4 : vector<1x256xf32> to vector<10x256xf32>
    %68 = vector.broadcast %58 : vector<10x1xf32> to vector<10x256xf32>
    %69 = arith.subf %67, %68 : vector<10x256xf32>
    %70 = vector.broadcast %7 : vector<1x256xf32> to vector<10x256xf32>
    %71 = vector.broadcast %60 : vector<10x1xf32> to vector<10x256xf32>
    %72 = arith.subf %70, %71 : vector<10x256xf32>
    %73 = vector.broadcast %62 : vector<10x1xf32> to vector<10x256xf32>
    %74 = arith.mulf %69, %73 : vector<10x256xf32>
    %75 = vector.broadcast %64 : vector<10x1xf32> to vector<10x256xf32>
    %76 = arith.mulf %72, %75 : vector<10x256xf32>
    %77 = arith.addf %74, %76 : vector<10x256xf32>
    %78 = vector.broadcast %66 : vector<10x1xf32> to vector<10x256xf32>
    %79 = arith.mulf %77, %78 : vector<10x256xf32>
    %cst_29 = arith.constant 0.000000e+00 : f32
    %cst_30 = arith.constant 1.000000e+00 : f32
    %80 = vector.broadcast %cst_29 : f32 to vector<10x256xf32>
    %81 = arith.maximumf %80, %79 : vector<10x256xf32>
    %82 = vector.broadcast %cst_30 : f32 to vector<10x256xf32>
    %83 = arith.minimumf %82, %81 : vector<10x256xf32>
    %84 = vector.broadcast %62 : vector<10x1xf32> to vector<10x256xf32>
    %85 = arith.mulf %83, %84 : vector<10x256xf32>
    %86 = arith.subf %69, %85 : vector<10x256xf32>
    %87 = vector.broadcast %64 : vector<10x1xf32> to vector<10x256xf32>
    %88 = arith.mulf %83, %87 : vector<10x256xf32>
    %89 = arith.subf %72, %88 : vector<10x256xf32>
    %90 = arith.mulf %86, %86 : vector<10x256xf32>
    %91 = arith.mulf %89, %89 : vector<10x256xf32>
    %92 = arith.addf %90, %91 : vector<10x256xf32>
    %93 = vector.broadcast %9 : vector<10x1xf32> to vector<10x256xf32>
    %94 = arith.mulf %92, %93 : vector<10x256xf32>
    %95 = math.sqrt %94 : vector<10x256xf32>
    %cst_31 = arith.constant 1.000000e+00 : f32
    %96 = vector.broadcast %cst_31 : f32 to vector<10x256xf32>
    %97 = arith.subf %96, %95 : vector<10x256xf32>
    %cst_32 = arith.constant 0.000000e+00 : f32
    %cst_33 = arith.constant 1.000000e+00 : f32
    %98 = vector.broadcast %cst_32 : f32 to vector<10x256xf32>
    %99 = arith.maximumf %98, %97 : vector<10x256xf32>
    %100 = vector.broadcast %cst_33 : f32 to vector<10x256xf32>
    %101 = arith.minimumf %100, %99 : vector<10x256xf32>
    %102 = arith.maximumf %56, %101 : vector<10x256xf32>
    %c2 = arith.constant 2 : index
    %c0_34 = arith.constant 0 : index
    %c0_35 = arith.constant 0 : index
    %103 = vector.load %arg0[%c2, %c0_34, %c0_35] : memref<24x10x1xf32, #tpu.memory_space<vmem>>, vector<1x10x1xf32>
    %104 = vector.shape_cast %103 : vector<1x10x1xf32> to vector<10x1xf32>
    %c6 = arith.constant 6 : index
    %c0_36 = arith.constant 0 : index
    %c0_37 = arith.constant 0 : index
    %105 = vector.load %arg0[%c6, %c0_36, %c0_37] : memref<24x10x1xf32, #tpu.memory_space<vmem>>, vector<1x10x1xf32>
    %106 = vector.shape_cast %105 : vector<1x10x1xf32> to vector<10x1xf32>
    %c10 = arith.constant 10 : index
    %c0_38 = arith.constant 0 : index
    %c0_39 = arith.constant 0 : index
    %107 = vector.load %arg0[%c10, %c0_38, %c0_39] : memref<24x10x1xf32, #tpu.memory_space<vmem>>, vector<1x10x1xf32>
    %108 = vector.shape_cast %107 : vector<1x10x1xf32> to vector<10x1xf32>
    %c14 = arith.constant 14 : index
    %c0_40 = arith.constant 0 : index
    %c0_41 = arith.constant 0 : index
    %109 = vector.load %arg0[%c14, %c0_40, %c0_41] : memref<24x10x1xf32, #tpu.memory_space<vmem>>, vector<1x10x1xf32>
    %110 = vector.shape_cast %109 : vector<1x10x1xf32> to vector<10x1xf32>
    %c18 = arith.constant 18 : index
    %c0_42 = arith.constant 0 : index
    %c0_43 = arith.constant 0 : index
    %111 = vector.load %arg0[%c18, %c0_42, %c0_43] : memref<24x10x1xf32, #tpu.memory_space<vmem>>, vector<1x10x1xf32>
    %112 = vector.shape_cast %111 : vector<1x10x1xf32> to vector<10x1xf32>
    %113 = vector.broadcast %4 : vector<1x256xf32> to vector<10x256xf32>
    %114 = vector.broadcast %104 : vector<10x1xf32> to vector<10x256xf32>
    %115 = arith.subf %113, %114 : vector<10x256xf32>
    %116 = vector.broadcast %7 : vector<1x256xf32> to vector<10x256xf32>
    %117 = vector.broadcast %106 : vector<10x1xf32> to vector<10x256xf32>
    %118 = arith.subf %116, %117 : vector<10x256xf32>
    %119 = vector.broadcast %108 : vector<10x1xf32> to vector<10x256xf32>
    %120 = arith.mulf %115, %119 : vector<10x256xf32>
    %121 = vector.broadcast %110 : vector<10x1xf32> to vector<10x256xf32>
    %122 = arith.mulf %118, %121 : vector<10x256xf32>
    %123 = arith.addf %120, %122 : vector<10x256xf32>
    %124 = vector.broadcast %112 : vector<10x1xf32> to vector<10x256xf32>
    %125 = arith.mulf %123, %124 : vector<10x256xf32>
    %cst_44 = arith.constant 0.000000e+00 : f32
    %cst_45 = arith.constant 1.000000e+00 : f32
    %126 = vector.broadcast %cst_44 : f32 to vector<10x256xf32>
    %127 = arith.maximumf %126, %125 : vector<10x256xf32>
    %128 = vector.broadcast %cst_45 : f32 to vector<10x256xf32>
    %129 = arith.minimumf %128, %127 : vector<10x256xf32>
    %130 = vector.broadcast %108 : vector<10x1xf32> to vector<10x256xf32>
    %131 = arith.mulf %129, %130 : vector<10x256xf32>
    %132 = arith.subf %115, %131 : vector<10x256xf32>
    %133 = vector.broadcast %110 : vector<10x1xf32> to vector<10x256xf32>
    %134 = arith.mulf %129, %133 : vector<10x256xf32>
    %135 = arith.subf %118, %134 : vector<10x256xf32>
    %136 = arith.mulf %132, %132 : vector<10x256xf32>
    %137 = arith.mulf %135, %135 : vector<10x256xf32>
    %138 = arith.addf %136, %137 : vector<10x256xf32>
    %139 = vector.broadcast %9 : vector<10x1xf32> to vector<10x256xf32>
    %140 = arith.mulf %138, %139 : vector<10x256xf32>
    %141 = math.sqrt %140 : vector<10x256xf32>
    %cst_46 = arith.constant 1.000000e+00 : f32
    %142 = vector.broadcast %cst_46 : f32 to vector<10x256xf32>
    %143 = arith.subf %142, %141 : vector<10x256xf32>
    %cst_47 = arith.constant 0.000000e+00 : f32
    %cst_48 = arith.constant 1.000000e+00 : f32
    %144 = vector.broadcast %cst_47 : f32 to vector<10x256xf32>
    %145 = arith.maximumf %144, %143 : vector<10x256xf32>
    %146 = vector.broadcast %cst_48 : f32 to vector<10x256xf32>
    %147 = arith.minimumf %146, %145 : vector<10x256xf32>
    %148 = arith.maximumf %102, %147 : vector<10x256xf32>
    %c3 = arith.constant 3 : index
    %c0_49 = arith.constant 0 : index
    %c0_50 = arith.constant 0 : index
    %149 = vector.load %arg0[%c3, %c0_49, %c0_50] : memref<24x10x1xf32, #tpu.memory_space<vmem>>, vector<1x10x1xf32>
    %150 = vector.shape_cast %149 : vector<1x10x1xf32> to vector<10x1xf32>
    %c7 = arith.constant 7 : index
    %c0_51 = arith.constant 0 : index
    %c0_52 = arith.constant 0 : index
    %151 = vector.load %arg0[%c7, %c0_51, %c0_52] : memref<24x10x1xf32, #tpu.memory_space<vmem>>, vector<1x10x1xf32>
    %152 = vector.shape_cast %151 : vector<1x10x1xf32> to vector<10x1xf32>
    %c11 = arith.constant 11 : index
    %c0_53 = arith.constant 0 : index
    %c0_54 = arith.constant 0 : index
    %153 = vector.load %arg0[%c11, %c0_53, %c0_54] : memref<24x10x1xf32, #tpu.memory_space<vmem>>, vector<1x10x1xf32>
    %154 = vector.shape_cast %153 : vector<1x10x1xf32> to vector<10x1xf32>
    %c15 = arith.constant 15 : index
    %c0_55 = arith.constant 0 : index
    %c0_56 = arith.constant 0 : index
    %155 = vector.load %arg0[%c15, %c0_55, %c0_56] : memref<24x10x1xf32, #tpu.memory_space<vmem>>, vector<1x10x1xf32>
    %156 = vector.shape_cast %155 : vector<1x10x1xf32> to vector<10x1xf32>
    %c19 = arith.constant 19 : index
    %c0_57 = arith.constant 0 : index
    %c0_58 = arith.constant 0 : index
    %157 = vector.load %arg0[%c19, %c0_57, %c0_58] : memref<24x10x1xf32, #tpu.memory_space<vmem>>, vector<1x10x1xf32>
    %158 = vector.shape_cast %157 : vector<1x10x1xf32> to vector<10x1xf32>
    %159 = vector.broadcast %4 : vector<1x256xf32> to vector<10x256xf32>
    %160 = vector.broadcast %150 : vector<10x1xf32> to vector<10x256xf32>
    %161 = arith.subf %159, %160 : vector<10x256xf32>
    %162 = vector.broadcast %7 : vector<1x256xf32> to vector<10x256xf32>
    %163 = vector.broadcast %152 : vector<10x1xf32> to vector<10x256xf32>
    %164 = arith.subf %162, %163 : vector<10x256xf32>
    %165 = vector.broadcast %154 : vector<10x1xf32> to vector<10x256xf32>
    %166 = arith.mulf %161, %165 : vector<10x256xf32>
    %167 = vector.broadcast %156 : vector<10x1xf32> to vector<10x256xf32>
    %168 = arith.mulf %164, %167 : vector<10x256xf32>
    %169 = arith.addf %166, %168 : vector<10x256xf32>
    %170 = vector.broadcast %158 : vector<10x1xf32> to vector<10x256xf32>
    %171 = arith.mulf %169, %170 : vector<10x256xf32>
    %cst_59 = arith.constant 0.000000e+00 : f32
    %cst_60 = arith.constant 1.000000e+00 : f32
    %172 = vector.broadcast %cst_59 : f32 to vector<10x256xf32>
    %173 = arith.maximumf %172, %171 : vector<10x256xf32>
    %174 = vector.broadcast %cst_60 : f32 to vector<10x256xf32>
    %175 = arith.minimumf %174, %173 : vector<10x256xf32>
    %176 = vector.broadcast %154 : vector<10x1xf32> to vector<10x256xf32>
    %177 = arith.mulf %175, %176 : vector<10x256xf32>
    %178 = arith.subf %161, %177 : vector<10x256xf32>
    %179 = vector.broadcast %156 : vector<10x1xf32> to vector<10x256xf32>
    %180 = arith.mulf %175, %179 : vector<10x256xf32>
    %181 = arith.subf %164, %180 : vector<10x256xf32>
    %182 = arith.mulf %178, %178 : vector<10x256xf32>
    %183 = arith.mulf %181, %181 : vector<10x256xf32>
    %184 = arith.addf %182, %183 : vector<10x256xf32>
    %185 = vector.broadcast %9 : vector<10x1xf32> to vector<10x256xf32>
    %186 = arith.mulf %184, %185 : vector<10x256xf32>
    %187 = math.sqrt %186 : vector<10x256xf32>
    %cst_61 = arith.constant 1.000000e+00 : f32
    %188 = vector.broadcast %cst_61 : f32 to vector<10x256xf32>
    %189 = arith.subf %188, %187 : vector<10x256xf32>
    %cst_62 = arith.constant 0.000000e+00 : f32
    %cst_63 = arith.constant 1.000000e+00 : f32
    %190 = vector.broadcast %cst_62 : f32 to vector<10x256xf32>
    %191 = arith.maximumf %190, %189 : vector<10x256xf32>
    %192 = vector.broadcast %cst_63 : f32 to vector<10x256xf32>
    %193 = arith.minimumf %192, %191 : vector<10x256xf32>
    %194 = arith.maximumf %148, %193 : vector<10x256xf32>
    %c21 = arith.constant 21 : index
    %c0_64 = arith.constant 0 : index
    %c0_65 = arith.constant 0 : index
    %195 = vector.load %arg0[%c21, %c0_64, %c0_65] : memref<24x10x1xf32, #tpu.memory_space<vmem>>, vector<3x10x1xf32>
    %196 = vector.shape_cast %194 : vector<10x256xf32> to vector<1x10x256xf32>
    %197 = vector.broadcast %195 : vector<3x10x1xf32> to vector<3x10x256xf32>
    %198 = vector.broadcast %196 : vector<1x10x256xf32> to vector<3x10x256xf32>
    %199 = arith.mulf %197, %198 : vector<3x10x256xf32>
    %cst_66 = arith.constant dense<0xFF800000> : vector<3x256xf32>
    %200 = vector.multi_reduction <maximumf>, %199, %cst_66 [1] : vector<3x10x256xf32> to vector<3x256xf32>
    %c0_67 = arith.constant 0 : index
    %c0_68 = arith.constant 0 : index
    %201 = vector.load %arg1[%c0_67, %c0_68] : memref<3x256xf32, #tpu.memory_space<vmem>>, vector<3x256xf32>
    tpu.vector_store %arg1[%c0_67, %c0_68], %200 {strides = array<i32>} : memref<3x256xf32, #tpu.memory_space<vmem>>, vector<3x256xf32>,
    return
  }
}

</mosaic_0001>

<bundles_post_ra>
// kernel: straight_renderer.1
= control target key start
LH: loop header
LB: loop body
LE: loop exit
PB: predicated region body
PF: predicated region fallthrough
CT: control target
= control target key end

     0   :  { %v929_v0 = vmov 0   ;;  %v8_v49 = vlaneseq  ;;  %s1537_s0 = inlined_call_operand.vmem [shape: f32[24,10,1], index: 0, kind: input, shape index: {}]   ;;  %s1538_s1 = inlined_call_operand.vmem [shape: f32[3,256], index: 1, kind: output, shape index: {}]  }
   0x1   :  { %896 = vset.pattern.permute.xlu1 %v929_v0  ;;  %895 = vset.pattern.permute.xlu0 %v929_v0  ;;  %v850_v1 = vld [vmem:[%s1537_s0 + $0x40] sm:$0xff]  ;;  %v851_v3 = vld [vmem:[%s1537_s0 + $0x48] sm:$0x3]  ;;  %v859_v13 = vld [vmem:[%s1537_s0 + $0x18] sm:$0x3] }
   0x2   :  { %v24_v2 = vld [vmem:[%s1537_s0] sm:$0xff]  ;;  %54 = vperm.xlu1 %896, %v850_v1   ;;  %v25_v4 = vld [vmem:[%s1537_s0 + $0x8] sm:$0x3]  ;;  %v858_v14 = vld [vmem:[%s1537_s0 + $0x10] sm:$0xff]  ;;  %v9_v50 = vand.u32 127, %v8_v49 }
   0x3   :  { %40 = vperm.xlu0 %895, %v24_v2   ;;  %v853_v5 = vld [vmem:[%s1537_s0 + $0x88] sm:$0x3]  ;;  %v852_v6 = vld [vmem:[%s1537_s0 + $0x80] sm:$0xff]  ;;  %v860_v15 = vld [vmem:[%s1537_s0 + $0x50] sm:$0xff] }
   0x4   :  { %v855_v7 = vld [vmem:[%s1537_s0 + $0xc8] sm:$0x3]  ;;  %v854_v8 = vld [vmem:[%s1537_s0 + $0xc0] sm:$0xff]  ;;  %v861_v16 = vld [vmem:[%s1537_s0 + $0x58] sm:$0x3]  ;;  %v10_v51 = vadd.s32 128, %v9_v50  ;;  %v11_v52 = vcvt.s32.f32 %v9_v50 }
   0x5   :  { %v857_v9 = vld [vmem:[%s1537_s0 + $0x108] sm:$0x3]  ;;  %v856_v10 = vld [vmem:[%s1537_s0 + $0x100] sm:$0xff]  ;;  %v865_v17 = vld [vmem:[%s1537_s0 + $0xd8] sm:$0x3] }
   0x6   :  { %59 = vperm.xlu1 %896, %v851_v3   ;;  %v849_v11 = vld [vmem:[%s1537_s0 + $0x148] sm:$0x3]  ;;  %v848_v12 = vld [vmem:[%s1537_s0 + $0x140] sm:$0xff]  ;;  %v863_v18 = vld [vmem:[%s1537_s0 + $0x98] sm:$0x3]  ;;  %v12_v53 = vcvt.s32.f32 %v10_v51  ;;  %v13_v54 = vmul.f32 0.0625, %v11_v52 }
   0x7   :  { %45 = vperm.xlu0 %895, %v25_v4   ;;  %v871_v19 = vld [vmem:[%s1537_s0 + $0x68] sm:$0x3]  ;;  %v864_v21 = vld [vmem:[%s1537_s0 + $0xd0] sm:$0xff]  ;;  %v870_v23 = vld [vmem:[%s1537_s0 + $0x60] sm:$0xff] }
   0x8   :  { %v869_v20 = vld [vmem:[%s1537_s0 + $0x28] sm:$0x3]  ;;  %v862_v22 = vld [vmem:[%s1537_s0 + $0x90] sm:$0xff]  ;;  %v868_v24 = vld [vmem:[%s1537_s0 + $0x20] sm:$0xff]  ;;  %v14_v55 = vmul.f32 0.0625, %v12_v53  ;;  %v1084_v56 = vfloor.f32 %v13_v54 }
   0x9   :  { %v875_v25 = vld [vmem:[%s1537_s0 + $0xe8] sm:$0x3]  ;;  %v881_v27 = vld [vmem:[%s1537_s0 + $0x78] sm:$0x3]  ;;  %v874_v29 = vld [vmem:[%s1537_s0 + $0xe0] sm:$0xff] }
   0xa   :  { %73 = vperm.xlu1 %896, %v853_v5   ;;  %v873_v26 = vld [vmem:[%s1537_s0 + $0xa8] sm:$0x3]  ;;  %v879_v28 = vld [vmem:[%s1537_s0 + $0x38] sm:$0x3]  ;;  %v872_v30 = vld [vmem:[%s1537_s0 + $0xa0] sm:$0xff]  ;;  %v1086_v57 = vfloor.f32 %v14_v55  ;;  %v17_v60 = vmul.f32 16.0, %v1084_v56 }
   0xb   :  { %68 = vperm.xlu0 %895, %v852_v6   ;;  %v880_v31 = vld [vmem:[%s1537_s0 + $0x70] sm:$0xff]  ;;  %v883_v33 = vld [vmem:[%s1537_s0 + $0xb8] sm:$0x3]  ;;  %v876_v39 = vld [vmem:[%s1537_s0 + $0x120] sm:$0xff] }
   0xc   :  { %v878_v32 = vld [vmem:[%s1537_s0 + $0x30] sm:$0xff]  ;;  %v867_v34 = vld [vmem:[%s1537_s0 + $0x118] sm:$0x3]  ;;  %v877_v40 = vld [vmem:[%s1537_s0 + $0x128] sm:$0x3]  ;;  %v18_v61 = vmul.f32 16.0, %v1086_v57  ;;  %v1090_v0 = vsub.f32 %v11_v52, %v17_v60 }
   0xd   :  { %v866_v35 = vld [vmem:[%s1537_s0 + $0x110] sm:$0xff]  ;;  %v885_v36 = vld [vmem:[%s1537_s0 + $0xf8] sm:$0x3]  ;;  %v890_v43 = vld [vmem:[%s1537_s0 + $0x160] sm:$0xff] }
   0xe   :  { %87 = vperm.xlu1 %896, %v855_v7   ;;  %v884_v37 = vld [vmem:[%s1537_s0 + $0xf0] sm:$0xff]  ;;  %v887_v42 = vld [vmem:[%s1537_s0 + $0x138] sm:$0x3]  ;;  %v891_v44 = vld [vmem:[%s1537_s0 + $0x168] sm:$0x3]  ;;  %v1092_v1 = vsub.f32 %v12_v53, %v18_v61 }
   0xf   :  { %82 = vperm.xlu0 %895, %v854_v8   ;;  %v882_v38 = vld [vmem:[%s1537_s0 + $0xb0] sm:$0xff]  ;;  %v893_v45 = vld [vmem:[%s1537_s0 + $0x178] sm:$0x3] }
  0x10   :  { %v886_v41 = vld [vmem:[%s1537_s0 + $0x130] sm:$0xff]  ;;  %v889_v46 = vld [vmem:[%s1537_s0 + $0x158] sm:$0x3] }
  0x11   :  { %v892_v47 = vld [vmem:[%s1537_s0 + $0x170] sm:$0xff] }
  0x12   :  { %105 = vperm.xlu1 %896, %v857_v9   ;;  %v888_v48 = vld [vmem:[%s1537_s0 + $0x150] sm:$0xff] }
  0x13   :  { %100 = vperm.xlu0 %895, %v856_v10  }
  0x16   :  { %155 = vperm.xlu1 %896, %v849_v11  }
  0x17   :  { %150 = vperm.xlu0 %895, %v848_v12  }
  0x1a   :  { %228 = vperm.xlu1 %896, %v859_v13  }
  0x1b   :  { %223 = vperm.xlu0 %895, %v858_v14  }
  0x1e   :  { %237 = vperm.xlu1 %896, %v860_v15  }
  0x1f   :  { %242 = vperm.xlu0 %895, %v861_v16  }
  0x22   :  { %270 = vperm.xlu1 %896, %v865_v17  }
  0x23   :  { %256 = vperm.xlu0 %895, %v863_v18  }
  0x26   :  { %415 = vperm.xlu1 %896, %v871_v19  }
  0x27   :  { %401 = vperm.xlu0 %895, %v869_v20  }
  0x2a   :  { %265 = vperm.xlu1 %896, %v864_v21  }
  0x2b   :  { %251 = vperm.xlu0 %895, %v862_v22  }
  0x2e   :  { %410 = vperm.xlu1 %896, %v870_v23  }
  0x2f   :  { %396 = vperm.xlu0 %895, %v868_v24  }
  0x32   :  { %443 = vperm.xlu1 %896, %v875_v25  }
  0x33   :  { %429 = vperm.xlu0 %895, %v873_v26  }
  0x36   :  { %588 = vperm.xlu1 %896, %v881_v27  }
  0x37   :  { %574 = vperm.xlu0 %895, %v879_v28  }
  0x3a   :  { %438 = vperm.xlu1 %896, %v874_v29  }
  0x3b   :  { %424 = vperm.xlu0 %895, %v872_v30  }
  0x3e   :  { %583 = vperm.xlu1 %896, %v880_v31  }
  0x3f   :  { %569 = vperm.xlu0 %895, %v878_v32  }
  0x42   :  { %602 = vperm.xlu1 %896, %v883_v33  }
  0x43   :  { %288 = vperm.xlu0 %895, %v867_v34  }
  0x46   :  { %283 = vperm.xlu1 %896, %v866_v35  }
  0x47   :  { %616 = vperm.xlu0 %895, %v885_v36  }
  0x4a   :  { %611 = vperm.xlu1 %896, %v884_v37  }
  0x4b   :  { %597 = vperm.xlu0 %895, %v882_v38  }
  0x4e   :  { %456 = vperm.xlu1 %896, %v876_v39  }
  0x4f   :  { %461 = vperm.xlu0 %895, %v877_v40  }
  0x52   :  { %629 = vperm.xlu1 %896, %v886_v41  }
  0x53   :  { %634 = vperm.xlu0 %895, %v887_v42  }
  0x56   :  { %744 = vperm.xlu1 %896, %v890_v43  }
  0x57   :  { %749 = vperm.xlu0 %895, %v891_v44  }
  0x5a   :  { %759 = vperm.xlu1 %896, %v893_v45  }
  0x5b   :  { %739 = vperm.xlu0 %895, %v889_v46  }
  0x5e   :  { %754 = vperm.xlu1 %896, %v892_v47  }
  0x5f   :  { %734 = vperm.xlu0 %895, %v888_v48  }
  0x81   :  { %v55_v58 = vpop.permute.xlu1 %54 }
  0x82   :  { %v41_v59 = vpop.permute.xlu0 %40  ;;  %v62_v8 = vsub.f32 %v1090_v0, %v55_v58  ;;  %v63_v9 = vsub.f32 %v1092_v1, %v55_v58 }
  0x83   :  { %v48_v4 = vsub.f32 %v1084_v56, %v41_v59  ;;  %v49_v5 = vsub.f32 %v1086_v57, %v41_v59 }
  0x85   :  { %v60_v62 = vpop.permute.xlu1 %59 }
  0x86   :  { %v46_v63 = vpop.permute.xlu0 %45  ;;  %v64_v10 = vsub.f32 %v1090_v0, %v60_v62  ;;  %v65_v11 = vsub.f32 %v1092_v1, %v60_v62 }
  0x87   :  { %v50_v6 = vsub.f32 %v1084_v56, %v46_v63  ;;  %v51_v7 = vsub.f32 %v1086_v57, %v46_v63 }
  0x89   :  { %v74_v2 = vpop.permute.xlu1 %73 }
  0x8a   :  { %v69_v3 = vpop.permute.xlu0 %68  ;;  %v78_v14 = vmul.f32 %v74_v2, %v50_v6  ;;  %v79_v15 = vmul.f32 %v74_v2, %v51_v7 }
  0x8b   :  { %v76_v16 = vmul.f32 %v69_v3, %v48_v4  ;;  %v77_v17 = vmul.f32 %v69_v3, %v49_v5 }
  0x8d   :  { %v88_v12 = vpop.permute.xlu1 %87 }
  0x8e   :  { %v83_v13 = vpop.permute.xlu0 %82  ;;  %v92_v18 = vmul.f32 %v88_v12, %v64_v10  ;;  %v93_v19 = vmul.f32 %v88_v12, %v65_v11 }
  0x8f   :  { %v90_v20 = vmul.f32 %v83_v13, %v62_v8  ;;  %v91_v21 = vmul.f32 %v83_v13, %v63_v9 }
  0x90   :  { %v96_v22 = vadd.f32 %v92_v18, %v78_v14  ;;  %v97_v23 = vadd.f32 %v93_v19, %v79_v15 }
  0x91   :  { %v94_v24 = vadd.f32 %v90_v20, %v76_v16  ;;  %v95_v25 = vadd.f32 %v91_v21, %v77_v17  ;;  %v106_v26 = vpop.permute.xlu1 %105 }
  0x92   :  { %v101_v27 = vpop.permute.xlu0 %100  ;;  %v110_v28 = vmul.f32 %v106_v26, %v96_v22  ;;  %v111_v29 = vmul.f32 %v106_v26, %v97_v23 }
  0x93   :  { %v108_v30 = vmul.f32 %v101_v27, %v94_v24  ;;  %v109_v31 = vmul.f32 %v101_v27, %v95_v25 }
  0x94   :  { %v114_v32 = vmax.f32 %v110_v28, 0.0  ;;  %v115_v33 = vmax.f32 %v111_v29, 0.0 }
  0x95   :  { %v112_v34 = vmax.f32 %v108_v30, 0.0  ;;  %v113_v35 = vmax.f32 %v109_v31, 0.0  ;;  %v1102_v36 = vpop.permute.xlu1 %155 }
  0x96   :  { %v1104_v37 = vpop.permute.xlu0 %150  ;;  %v118_v38 = vmin.f32 %v114_v32, 1.0  ;;  %v119_v39 = vmin.f32 %v115_v33, 1.0 }
  0x97   :  { %v116_v40 = vmin.f32 %v112_v34, 1.0  ;;  %v117_v41 = vmin.f32 %v113_v35, 1.0 }
  0x98   :  { %v122_v42 = vmul.f32 %v118_v38, %v74_v2  ;;  %v123_v43 = vmul.f32 %v119_v39, %v74_v2  ;;  %v130_v44 = vmul.f32 %v118_v38, %v88_v12  ;;  %v131_v45 = vmul.f32 %v119_v39, %v88_v12 }
  0x99   :  { %v120_v46 = vmul.f32 %v116_v40, %v69_v3  ;;  %v121_v47 = vmul.f32 %v117_v41, %v69_v3  ;;  %v128_v48 = vmul.f32 %v116_v40, %v83_v13  ;;  %v129_v49 = vmul.f32 %v117_v41, %v83_v13  ;;  %v229_v50 = vpop.permute.xlu1 %228 }
  0x9a   :  { %v224_v51 = vpop.permute.xlu0 %223  ;;  %v126_v52 = vsub.f32 %v50_v6, %v122_v42  ;;  %v127_v53 = vsub.f32 %v51_v7, %v123_v43  ;;  %v134_v54 = vsub.f32 %v64_v10, %v130_v44  ;;  %v135_v55 = vsub.f32 %v65_v11, %v131_v45 }
  0x9b   :  { %v124_v58 = vsub.f32 %v48_v4, %v120_v46  ;;  %v125_v59 = vsub.f32 %v49_v5, %v121_v47  ;;  %v132_v60 = vsub.f32 %v62_v8, %v128_v48  ;;  %v133_v61 = vsub.f32 %v63_v9, %v129_v49 }
  0x9c   :  { %v138_v62 = vmul.f32 %v126_v52, %v126_v52  ;;  %v139_v63 = vmul.f32 %v127_v53, %v127_v53  ;;  %v142_v14 = vmul.f32 %v134_v54, %v134_v54  ;;  %v143_v2 = vmul.f32 %v135_v55, %v135_v55 }
  0x9d   :  { %v136_v15 = vmul.f32 %v124_v58, %v124_v58  ;;  %v137_v12 = vmul.f32 %v125_v59, %v125_v59  ;;  %v140_v16 = vmul.f32 %v132_v60, %v132_v60  ;;  %v141_v3 = vmul.f32 %v133_v61, %v133_v61  ;;  %v238_v17 = vpop.permute.xlu1 %237 }
  0x9e   :  { %v243_v13 = vpop.permute.xlu0 %242  ;;  %v146_v18 = vadd.f32 %v142_v14, %v138_v62  ;;  %v147_v19 = vadd.f32 %v143_v2, %v139_v63  ;;  %v1136_v30 = vsub.f32 %v1084_v56, %v229_v50  ;;  %v1139_v31 = vsub.f32 %v1086_v57, %v229_v50 }
  0x9f   :  { %v144_v6 = vadd.f32 %v140_v16, %v136_v15  ;;  %v145_v7 = vadd.f32 %v141_v3, %v137_v12  ;;  %v1142_v32 = vsub.f32 %v1090_v0, %v243_v13  ;;  %v1145_v33 = vsub.f32 %v1092_v1, %v243_v13 }
  0xa0   :  { %v160_v10 = vmul.f32 %v1102_v36, %v146_v18  ;;  %v1122_v23 = vmul.f32 %v1102_v36, %v147_v19  ;;  %v1160_v45 = vsub.f32 %v1084_v56, %v224_v51  ;;  %v1163_v46 = vsub.f32 %v1086_v57, %v224_v51 }
  0xa1   :  { %v1107_v4 = vpop.permute.xlu1 %270  ;;  %v1112_v11 = vmul.f32 %v1104_v37, %v144_v6  ;;  %v1115_v20 = vmul.f32 %v1104_v37, %v145_v7  ;;  %v1166_v48 = vsub.f32 %v1090_v0, %v238_v17  ;;  %v1169_v49 = vsub.f32 %v1092_v1, %v238_v17 }
  0xa2   :  { %v1109_v5 = vpop.permute.xlu0 %256  ;;  %897 = vrsqrt.f32 %v160_v10  ;;  %vm178_vm0 = vcmp.eq.f32.partialorder %v160_v10, inf  ;;  %v275_v41 = vmul.f32 %v1107_v4, %v1142_v32  ;;  %v276_v42 = vmul.f32 %v1107_v4, %v1145_v33 }
  0xa3   :  { %899 = vrsqrt.f32 %v1112_v11  ;;  %v261_v34 = vmul.f32 %v1109_v5, %v1136_v30  ;;  %v262_v40 = vmul.f32 %v1109_v5, %v1139_v31  ;;  %v181_v47 = vand.u32 2147483648, %v160_v10 }
  0xa4   :  { %901 = vrsqrt.f32 %v1115_v20  ;;  %vm164_vm1 = vcmp.eq.f32.partialorder %v1112_v11, inf  ;;  %vm180_vm2 = vcmp.eq.f32.partialorder %v160_v10, 0.0  ;;  %vm166_vm3 = vcmp.eq.f32.partialorder %v1112_v11, 0.0 }
  0xa5   :  { %v416_v8 = vpop.permute.xlu1 %415  ;;  %903 = vrsqrt.f32 %v1122_v23  ;;  %v167_v52 = vand.u32 2147483648, %v1112_v11  ;;  %vm171_vm4 = vcmp.eq.f32.partialorder %v1115_v20, inf  ;;  %v279_v55 = vadd.f32 %v275_v41, %v261_v34 }
  0xa6   :  { %v402_v9 = vpop.permute.xlu0 %401  ;;  %v280_v58 = vadd.f32 %v276_v42, %v262_v40  ;;  %v1182_v61 = vsub.f32 %v1090_v0, %v416_v8  ;;  %vm173_vm5 = vcmp.eq.f32.partialorder %v1115_v20, 0.0  ;;  %v174_v63 = vand.u32 2147483648, %v1115_v20 }
  0xa7   :  { %v1185_v62 = vsub.f32 %v1084_v56, %v402_v9  ;;  %v1195_v16 = vsub.f32 %v1092_v1, %v416_v8  ;;  %v1198_v3 = vsub.f32 %v1086_v57, %v402_v9  ;;  %vm185_vm6 = vcmp.eq.f32.partialorder %v1122_v23, inf }
  0xa8   :  { %vm187_vm7 = vcmp.eq.f32.partialorder %v1122_v23, 0.0 }
  0xa9   :  { %v1117_v21 = vpop.permute.xlu1 %265 }
  0xaa   :  { %v1119_v22 = vpop.permute.xlu0 %251  ;;  %v273_v14 = vmul.f32 %v1117_v21, %v1166_v48  ;;  %v274_v17 = vmul.f32 %v1117_v21, %v1169_v49 }
  0xab   :  { %v259_v2 = vmul.f32 %v1119_v22, %v1160_v45  ;;  %v260_v13 = vmul.f32 %v1119_v22, %v1163_v46 }
  0xac   :  { %v898_v26 = vpop.eup %897 }
  0xad   :  { %v1126_v24 = vpop.permute.xlu1 %410  ;;  %v177_v29 = vmul.f32 %v898_v26, %v160_v10  ;;  %v900_v35 = vpop.eup %899  ;;  %v278_v42 = vadd.f32 %v274_v17, %v260_v13 }
  0xae   :  { %v1128_v25 = vpop.permute.xlu0 %396  ;;  %v902_v44 = vpop.eup %901  ;;  %v163_v59 = vmul.f32 %v900_v35, %v1112_v11  ;;  %v188_v35 = vand.u32 2147483648, %v1122_v23  ;;  %v1230_v41 = vsub.f32 %v1090_v0, %v1126_v24 }
  0xaf   :  { %v179_v43 = vsel %vm178_vm0, %v160_v10, %v177_v29  ;;  %v904_v50 = vpop.eup %903  ;;  %v170_v60 = vmul.f32 %v902_v44, %v1115_v20  ;;  %v277_v29 = vadd.f32 %v273_v14, %v259_v2 }
  0xb0   :  { %v182_v53 = vsel %vm180_vm2, %v181_v47, %v179_v43  ;;  %v184_v15 = vmul.f32 %v904_v50, %v1122_v23  ;;  %v165_v10 = vsel %vm164_vm1, %v1112_v11, %v163_v59  ;;  %v1238_v47 = vsub.f32 %v1092_v1, %v1126_v24 }
  0xb1   :  { %v1131_v27 = vpop.permute.xlu1 %443  ;;  %v192_v12 = vsub.f32 1.0, %v182_v53  ;;  %v172_v8 = vsel %vm171_vm4, %v1115_v20, %v170_v60  ;;  %v168_v43 = vsel %vm166_vm3, %v167_v52, %v165_v10  ;;  %v1242_v50 = vsub.f32 %v1084_v56, %v1128_v25 }
  0xb2   :  { %v1133_v28 = vpop.permute.xlu0 %429  ;;  %v448_v7 = vmul.f32 %v1131_v27, %v1182_v61  ;;  %v449_v26 = vmul.f32 %v1131_v27, %v1195_v16  ;;  %v186_v34 = vsel %vm185_vm6, %v1122_v23, %v184_v15  ;;  %v175_v44 = vsel %vm173_vm5, %v174_v63, %v172_v8 }
  0xb3   :  { %v434_v6 = vmul.f32 %v1133_v28, %v1185_v62  ;;  %v435_v9 = vmul.f32 %v1133_v28, %v1198_v3  ;;  %v1226_v40 = vmax.f32 %v192_v12, 0.0  ;;  %v1246_v53 = vsub.f32 %v1086_v57, %v1128_v25 }
  0xb4   :  { %v189_v24 = vsel %vm187_vm7, %v188_v35, %v186_v34  ;;  %v190_v2 = vsub.f32 1.0, %v168_v43  ;;  %v191_v15 = vsub.f32 1.0, %v175_v44 }
  0xb5   :  { %v1149_v38 = vpop.permute.xlu1 %588  ;;  %1540 = vst [vmem:[#allocation2_spill] sm:$0xff] %v1226_v40  ;;  %v1250_v11 = vadd.f32 %v448_v7, %v434_v6  ;;  %v1252_v63 = vadd.f32 %v449_v26, %v435_v9  ;;  %v193_v10 = vsub.f32 1.0, %v189_v24 }
  0xb6   :  { %v1151_v39 = vpop.permute.xlu0 %574  ;;  %v1258_v14 = vsub.f32 %v1090_v0, %v1149_v38  ;;  %v1263_v12 = vsub.f32 %v1092_v1, %v1149_v38  ;;  %v1283_v43 = vmax.f32 %v190_v2, 0.0  ;;  %v1285_v44 = vmax.f32 %v191_v15, 0.0 }
  0xb7   :  { %v1271_v23 = vsub.f32 %v1086_v57, %v1151_v39  ;;  %v1295_v25 = vmax.f32 %v193_v10, 0.0 }
  0xb9   :  { %v1175_v51 = vpop.permute.xlu1 %438 }
  0xba   :  { %v1177_v54 = vpop.permute.xlu0 %424  ;;  %v446_v7 = vmul.f32 %v1175_v51, %v1230_v41  ;;  %v447_v35 = vmul.f32 %v1175_v51, %v1238_v47 }
  0xbb   :  { %v432_v38 = vmul.f32 %v1177_v54, %v1242_v50 }
  0xbd   :  { %v1204_v18 = vpop.permute.xlu1 %583 }
  0xbe   :  { %v1206_v19 = vpop.permute.xlu0 %569 }
  0xc1   :  { %v1248_v59 = vpop.permute.xlu1 %602 }
  0xc2   :  { %v289_v60 = vpop.permute.xlu0 %288 }
  0xc3   :  { %v293_v52 = vmul.f32 %v289_v60, %v279_v55  ;;  %v294_v20 = vmul.f32 %v289_v60, %v280_v58  ;;  %v1267_v55 = vsub.f32 %v1084_v56, %v1151_v39  ;;  %v433_v39 = vmul.f32 %v1177_v54, %v1246_v53 }
  0xc5   :  { %v297_v58 = vmax.f32 %v293_v52, 0.0  ;;  %v298_v17 = vmax.f32 %v294_v20, 0.0  ;;  %v284_v13 = vpop.permute.xlu1 %283 }
  0xc6   :  { %v1273_v6 = vpop.permute.xlu0 %616  ;;  %v291_v26 = vmul.f32 %v284_v13, %v277_v29  ;;  %v292_v34 = vmul.f32 %v284_v13, %v278_v42  ;;  %v450_v13 = vadd.f32 %v446_v7, %v432_v38  ;;  %v1307_v7 = vsub.f32 %v1092_v1, %v1204_v18 }
  0xc7   :  { %v301_v8 = vmin.f32 %v297_v58, 1.0  ;;  %v302_v9 = vmin.f32 %v298_v17, 1.0 }
  0xc8   :  { %v295_v29 = vmax.f32 %v291_v26, 0.0  ;;  %v296_v42 = vmax.f32 %v292_v34, 0.0  ;;  %v451_v26 = vadd.f32 %v447_v35, %v433_v39 }
  0xc9   :  { %v305_v60 = vmul.f32 %v301_v8, %v1109_v5  ;;  %v306_v52 = vmul.f32 %v302_v9, %v1109_v5  ;;  %v313_v20 = vmul.f32 %v301_v8, %v1107_v4  ;;  %v314_v24 = vmul.f32 %v302_v9, %v1107_v4  ;;  %v1291_v58 = vpop.permute.xlu1 %611 }
  0xca   :  { %v1293_v17 = vpop.permute.xlu0 %597  ;;  %v1303_v4 = vsub.f32 %v1090_v0, %v1204_v18  ;;  %v299_v8 = vmin.f32 %v295_v29, 1.0  ;;  %v300_v9 = vmin.f32 %v296_v42, 1.0 }
  0xcb   :  { %v309_v2 = vsub.f32 %v1136_v30, %v305_v60  ;;  %v310_v15 = vsub.f32 %v1139_v31, %v306_v52  ;;  %v317_v40 = vsub.f32 %v1142_v32, %v313_v20  ;;  %v318_v5 = vsub.f32 %v1145_v33, %v314_v24 }
  0xcc   :  { %v1311_v30 = vsub.f32 %v1084_v56, %v1206_v19  ;;  %v303_v32 = vmul.f32 %v299_v8, %v1119_v22  ;;  %v304_v33 = vmul.f32 %v300_v9, %v1119_v22  ;;  %v311_v0 = vmul.f32 %v299_v8, %v1117_v21 }
  0xcd   :  { %v321_v31 = vmul.f32 %v309_v2, %v309_v2  ;;  %v322_v38 = vmul.f32 %v310_v15, %v310_v15  ;;  %v312_v10 = vmul.f32 %v300_v9, %v1117_v21  ;;  %v457_v34 = vpop.permute.xlu1 %456  ;;  %v325_v35 = vmul.f32 %v317_v40, %v317_v40 }
  0xce   :  { %v326_v39 = vmul.f32 %v318_v5, %v318_v5  ;;  %v464_v60 = vmul.f32 %v457_v34, %v450_v13  ;;  %v465_v1 = vmul.f32 %v457_v34, %v451_v26  ;;  %v307_v18 = vsub.f32 %v1160_v45, %v303_v32  ;;  %v462_v24 = vpop.permute.xlu0 %461 }
  0xcf   :  { %v308_v56 = vsub.f32 %v1163_v46, %v304_v33  ;;  %v315_v52 = vsub.f32 %v1166_v48, %v311_v0  ;;  %v316_v20 = vsub.f32 %v1169_v49, %v312_v10  ;;  %v1323_v22 = vsub.f32 %v1086_v57, %v1206_v19 }
  0xd0   :  { %v468_v29 = vmax.f32 %v464_v60, 0.0  ;;  %v469_v21 = vmax.f32 %v465_v1, 0.0  ;;  %v619_v40 = vmul.f32 %v1291_v58, %v1303_v4  ;;  %v319_v42 = vmul.f32 %v307_v18, %v307_v18 }
  0xd1   :  { %v320_v13 = vmul.f32 %v308_v56, %v308_v56  ;;  %v323_v2 = vmul.f32 %v315_v52, %v315_v52  ;;  %v324_v45 = vmul.f32 %v316_v20, %v316_v20  ;;  %v329_v15 = vadd.f32 %v325_v35, %v321_v31  ;;  %v630_v56 = vpop.permute.xlu1 %629 }
  0xd2   :  { %v472_v46 = vmin.f32 %v468_v29, 1.0  ;;  %v473_v5 = vmin.f32 %v469_v21, 1.0  ;;  %v466_v48 = vmul.f32 %v462_v24, %v1250_v11  ;;  %v330_v49 = vadd.f32 %v326_v39, %v322_v38 }
  0xd3   :  { %v327_v8 = vadd.f32 %v323_v2, %v319_v42  ;;  %v328_v9 = vadd.f32 %v324_v45, %v320_v13  ;;  %v467_v57 = vmul.f32 %v462_v24, %v1252_v63  ;;  %v605_v39 = vmul.f32 %v1293_v17, %v1311_v30  ;;  %v635_v45 = vpop.permute.xlu0 %634 }
  0xd4   :  { %v476_v19 = vmul.f32 %v472_v46, %v1177_v54  ;;  %v477_v26 = vmul.f32 %v473_v5, %v1177_v54  ;;  %v484_v32 = vmul.f32 %v472_v46, %v1175_v51  ;;  %v485_v33 = vmul.f32 %v473_v5, %v1175_v51 }
  0xd5   :  { %v1334_v0 = vmul.f32 %v327_v8, %v1104_v37  ;;  %v1337_v31 = vmul.f32 %v328_v9, %v1104_v37  ;;  %v470_v11 = vmax.f32 %v466_v48, 0.0  ;;  %v471_v38 = vmax.f32 %v467_v57, 0.0 }
  0xd6   :  { %v480_v10 = vsub.f32 %v1242_v50, %v476_v19  ;;  %v481_v63 = vsub.f32 %v1246_v53, %v477_v26  ;;  %v488_v34 = vsub.f32 %v1230_v41, %v484_v32  ;;  %v489_v54 = vsub.f32 %v1238_v47, %v485_v33 }
  0xd7   :  { %905 = vrsqrt.f32 %v1334_v0  ;;  %v474_v35 = vmin.f32 %v470_v11, 1.0  ;;  %v475_v51 = vmin.f32 %v471_v38, 1.0  ;;  %v620_v60 = vmul.f32 %v1291_v58, %v1307_v7 }
  0xd8   :  { %907 = vrsqrt.f32 %v1337_v31  ;;  %v621_v50 = vmul.f32 %v1273_v6, %v1258_v14  ;;  %v622_v41 = vmul.f32 %v1273_v6, %v1263_v12  ;;  %v492_v53 = vmul.f32 %v480_v10, %v480_v10 }
  0xd9   :  { %v493_v47 = vmul.f32 %v481_v63, %v481_v63  ;;  %v496_v1 = vmul.f32 %v488_v34, %v488_v34  ;;  %v497_v18 = vmul.f32 %v489_v54, %v489_v54  ;;  %v1354_v52 = vmul.f32 %v329_v15, %v1102_v36 }
  0xda   :  { %v606_v20 = vmul.f32 %v1293_v17, %v1323_v22  ;;  %v623_v24 = vadd.f32 %v619_v40, %v605_v39  ;;  %v607_v29 = vmul.f32 %v1248_v59, %v1267_v55  ;;  %v1361_v21 = vmul.f32 %v330_v49, %v1102_v36 }
  0xdb   :  { %v478_v42 = vmul.f32 %v474_v35, %v1133_v28  ;;  %v479_v13 = vmul.f32 %v475_v51, %v1133_v28  ;;  %v608_v2 = vmul.f32 %v1248_v59, %v1271_v23  ;;  %v486_v15 = vmul.f32 %v474_v35, %v1131_v27 }
  0xdc   :  { %v624_v46 = vadd.f32 %v620_v60, %v606_v20  ;;  %v637_v5 = vmul.f32 %v630_v56, %v623_v24  ;;  %v625_v48 = vadd.f32 %v621_v50, %v607_v29  ;;  %v500_v40 = vadd.f32 %v496_v1, %v492_v53 }
  0xdd   :  { %v501_v8 = vadd.f32 %v497_v18, %v493_v47  ;;  %v487_v9 = vmul.f32 %v475_v51, %v1131_v27  ;;  %v626_v57 = vadd.f32 %v622_v41, %v608_v2  ;;  %909 = vrsqrt.f32 %v1354_v52 }
  0xde   :  { %v638_v49 = vmul.f32 %v630_v56, %v624_v46  ;;  %v641_v19 = vmax.f32 %v637_v5, 0.0  ;;  %v639_v26 = vmul.f32 %v635_v45, %v625_v48  ;;  %911 = vrsqrt.f32 %v1361_v21 }
  0xdf   :  { %v482_v28 = vsub.f32 %v1185_v62, %v478_v42  ;;  %v483_v32 = vsub.f32 %v1198_v3, %v479_v13  ;;  %v640_v33 = vmul.f32 %v635_v45, %v626_v57  ;;  %v490_v11 = vsub.f32 %v1182_v61, %v486_v15 }
  0xe0   :  { %v642_v38 = vmax.f32 %v638_v49, 0.0  ;;  %v645_v10 = vmin.f32 %v641_v19, 1.0  ;;  %v643_v63 = vmax.f32 %v639_v26, 0.0  ;;  %v1375_v27 = vmul.f32 %v500_v40, %v1104_v37 }
  0xe1   :  { %v906_v34 = vpop.eup %905  ;;  %v1378_v54 = vmul.f32 %v501_v8, %v1104_v37  ;;  %v491_v35 = vsub.f32 %v1195_v16, %v487_v9  ;;  %v644_v51 = vmax.f32 %v640_v33, 0.0  ;;  %vm337_vm8 = vcmp.eq.f32.partialorder %v1334_v0, inf }
  0xe2   :  { %v908_v39 = vpop.eup %907  ;;  %v646_v62 = vmin.f32 %v642_v38, 1.0  ;;  %v649_v3 = vmul.f32 %v645_v10, %v1293_v17  ;;  %v657_v60 = vmul.f32 %v645_v10, %v1291_v58  ;;  %v647_v61 = vmin.f32 %v643_v63, 1.0 }
  0xe3   :  { %v648_v50 = vmin.f32 %v644_v51, 1.0  ;;  %v336_v41 = vmul.f32 %v906_v34, %v1334_v0  ;;  %v343_v53 = vmul.f32 %v908_v39, %v1337_v31  ;;  %v495_v48 = vmul.f32 %v483_v32, %v483_v32 }
  0xe4   :  { %v650_v47 = vmul.f32 %v646_v62, %v1293_v17  ;;  %v653_v1 = vsub.f32 %v1311_v30, %v649_v3  ;;  %v658_v16 = vmul.f32 %v646_v62, %v1291_v58  ;;  %v661_v18 = vsub.f32 %v1303_v4, %v657_v60 }
  0xe5   :  { %v651_v56 = vmul.f32 %v647_v61, %v1248_v59  ;;  %v652_v20 = vmul.f32 %v648_v50, %v1248_v59  ;;  %v659_v24 = vmul.f32 %v647_v61, %v1273_v6  ;;  %v660_v29 = vmul.f32 %v648_v50, %v1273_v6 }
  0xe6   :  { %v654_v42 = vsub.f32 %v1323_v22, %v650_v47  ;;  %v662_v13 = vsub.f32 %v1307_v7, %v658_v16  ;;  %v665_v2 = vmul.f32 %v653_v1, %v653_v1  ;;  %v669_v17 = vmul.f32 %v661_v18, %v661_v18 }
  0xe7   :  { %v655_v30 = vsub.f32 %v1267_v55, %v651_v56  ;;  %v656_v58 = vsub.f32 %v1271_v23, %v652_v20  ;;  %v663_v4 = vsub.f32 %v1258_v14, %v659_v24  ;;  %v664_v45 = vsub.f32 %v1263_v12, %v660_v29  ;;  %v910_v15 = vpop.eup %909 }
  0xe8   :  { %v666_v59 = vmul.f32 %v654_v42, %v654_v42  ;;  %v670_v46 = vmul.f32 %v662_v13, %v662_v13  ;;  %v673_v5 = vadd.f32 %v669_v17, %v665_v2  ;;  %v338_v6 = vsel %vm337_vm8, %v1334_v0, %v336_v41  ;;  %v912_v22 = vpop.eup %911 }
  0xe9   :  { %v494_v7 = vmul.f32 %v482_v28, %v482_v28  ;;  %v498_v40 = vmul.f32 %v490_v11, %v490_v11  ;;  %v340_v55 = vand.u32 2147483648, %v1334_v0  ;;  %v499_v8 = vmul.f32 %v491_v35, %v491_v35 }
  0xea   :  { %v674_v23 = vadd.f32 %v670_v46, %v666_v59  ;;  %vm339_vm9 = vcmp.eq.f32.partialorder %v1334_v0, 0.0  ;;  %vm344_vm10 = vcmp.eq.f32.partialorder %v1337_v31, inf  ;;  %v1407_v14 = vmul.f32 %v673_v5, %v1104_v37 }
  0xeb   :  { %v667_v12 = vmul.f32 %v655_v30, %v655_v30  ;;  %v668_v9 = vmul.f32 %v656_v58, %v656_v58  ;;  %v341_v57 = vsel %vm339_vm9, %v340_v55, %v338_v6  ;;  %v671_v49 = vmul.f32 %v663_v4, %v663_v4 }
  0xec   :  { %v672_v19 = vmul.f32 %v664_v45, %v664_v45  ;;  %v345_v26 = vsel %vm344_vm10, %v1337_v31, %v343_v53  ;;  %913 = vrsqrt.f32 %v1375_v27  ;;  %v502_v28 = vadd.f32 %v498_v40, %v494_v7 }
  0xed   :  { %v1412_v32 = vmul.f32 %v674_v23, %v1104_v37  ;;  %v198_v0 = vmin.f32 %v1283_v43, 1.0  ;;  %v347_v33 = vand.u32 2147483648, %v1337_v31  ;;  %v199_v11 = vmin.f32 %v1285_v44, 1.0 }
  0xee   :  { %vm346_vm11 = vcmp.eq.f32.partialorder %v1337_v31, 0.0  ;;  %v363_v38 = vsub.f32 1.0, %v341_v57  ;;  %915 = vrsqrt.f32 %v1378_v54  ;;  %v503_v10 = vadd.f32 %v499_v8, %v495_v48  ;;  %v1541_v31 = vld [vmem:[#allocation2_spill] sm:$0xff] }
  0xef   :  { %v348_v63 = vsel %vm346_vm11, %v347_v33, %v345_v26  ;;  %917 = vrsqrt.f32 %v1407_v14  ;;  %v201_v34 = vmin.f32 %v1295_v25, 1.0  ;;  %v675_v35 = vadd.f32 %v671_v49, %v667_v12 }
  0xf0   :  { %v676_v37 = vadd.f32 %v672_v19, %v668_v9  ;;  %v1422_v51 = vmul.f32 %v502_v28, %v1102_v36  ;;  %919 = vrsqrt.f32 %v1412_v32  ;;  %v202_v43 = vmax.f32 %v198_v0, 0.0 }
  0xf1   :  { %v364_v44 = vsub.f32 1.0, %v348_v63  ;;  %v367_v39 = vmax.f32 %v363_v38, 0.0  ;;  %v1542_v62 = vmin.f32 %v1541_v31, 1.0  ;;  %v1430_v60 = vmul.f32 %v503_v10, %v1102_v36  ;;  %v1502_v10 = vpop.permute.xlu1 %744 }
  0xf2   :  { %v1432_v61 = vmax.f32 %v199_v11, 0.0  ;;  %v1434_v25 = vmax.f32 %v201_v34, 0.0  ;;  %v350_v50 = vmul.f32 %v910_v15, %v1354_v52  ;;  %v1438_v41 = vmul.f32 %v675_v35, %v1102_v36  ;;  %v1507_v35 = vpop.permute.xlu0 %749 }
  0xf3   :  { %v1427_v3 = vmax.f32 %v1542_v62, 0.0  ;;  %v1441_v53 = vmul.f32 %v676_v37, %v1102_v36  ;;  %vm510_vm12 = vcmp.eq.f32.partialorder %v1375_v27, inf  ;;  %vm512_vm13 = vcmp.eq.f32.partialorder %v1375_v27, 0.0 }
  0xf4   :  { %v513_v47 = vand.u32 2147483648, %v1375_v27  ;;  %vm517_vm14 = vcmp.eq.f32.partialorder %v1378_v54, inf  ;;  %vm519_vm15 = vcmp.eq.f32.partialorder %v1378_v54, 0.0  ;;  %921 = vrsqrt.f32 %v1422_v51 }
  0xf5   :  { %v1449_v16 = vmax.f32 %v364_v44, 0.0  ;;  %v371_v18 = vmin.f32 %v367_v39, 1.0  ;;  %v520_v56 = vand.u32 2147483648, %v1378_v54  ;;  %vm351_vm0 = vcmp.eq.f32.partialorder %v1354_v52, inf }
  0xf6   :  { %v914_v1 = vpop.eup %913  ;;  %v352_v20 = vsel %vm351_vm0, %v1354_v52, %v350_v50  ;;  %v357_v24 = vmul.f32 %v912_v22, %v1361_v21  ;;  %923 = vrsqrt.f32 %v1430_v60  ;;  %vm683_vm1 = vcmp.eq.f32.partialorder %v1407_v14, inf }
  0xf7   :  { %v509_v36 = vmul.f32 %v914_v1, %v1375_v27  ;;  %vm685_vm2 = vcmp.eq.f32.partialorder %v1407_v14, 0.0  ;;  %v686_v42 = vand.u32 2147483648, %v1407_v14  ;;  %v354_v13 = vand.u32 2147483648, %v1354_v52 }
  0xf8   :  { %v916_v29 = vpop.eup %915  ;;  %vm353_vm3 = vcmp.eq.f32.partialorder %v1354_v52, 0.0  ;;  %925 = vrsqrt.f32 %v1438_v41  ;;  %vm690_vm4 = vcmp.eq.f32.partialorder %v1412_v32, inf  ;;  %vm358_vm5 = vcmp.eq.f32.partialorder %v1361_v21, inf }
  0xf9   :  { %v918_v2 = vpop.eup %917  ;;  %v511_v17 = vsel %vm510_vm12, %v1375_v27, %v509_v36  ;;  %v516_v30 = vmul.f32 %v916_v29, %v1378_v54  ;;  %v355_v4 = vsel %vm353_vm3, %v354_v13, %v352_v20  ;;  %vm692_vm6 = vcmp.eq.f32.partialorder %v1412_v32, 0.0 }
  0xfa   :  { %v682_v58 = vmul.f32 %v918_v2, %v1407_v14  ;;  %v920_v45 = vpop.eup %919  ;;  %v514_v15 = vsel %vm512_vm13, %v513_v47, %v511_v17  ;;  %v359_v52 = vsel %vm358_vm5, %v1361_v21, %v357_v24  ;;  %v693_v6 = vand.u32 2147483648, %v1412_v32 }
  0xfb   :  { %v518_v59 = vsel %vm517_vm14, %v1378_v54, %v516_v30  ;;  %v689_v5 = vmul.f32 %v920_v45, %v1412_v32  ;;  %v361_v22 = vand.u32 2147483648, %v1361_v21  ;;  %vm360_vm7 = vcmp.eq.f32.partialorder %v1361_v21, 0.0  ;;  %v740_v45 = vpop.permute.xlu0 %739 }
  0xfc   :  { %v684_v46 = vsel %vm683_vm1, %v1407_v14, %v682_v58  ;;  %v521_v27 = vsel %vm519_vm15, %v520_v56, %v518_v59  ;;  %v365_v48 = vsub.f32 1.0, %v355_v4  ;;  %v536_v40 = vsub.f32 1.0, %v514_v15  ;;  %v760_v4 = vpop.permute.xlu1 %759 }
  0xfd   :  { %v687_v7 = vsel %vm685_vm2, %v686_v42, %v684_v46  ;;  %v691_v55 = vsel %vm690_vm4, %v1412_v32, %v689_v5  ;;  %v362_v8 = vsel %vm360_vm7, %v361_v22, %v359_v52  ;;  %927 = vrsqrt.f32 %v1441_v53 }
  0xfe   :  { %v922_v23 = vpop.eup %921  ;;  %v372_v12 = vmin.f32 %v1449_v16, 1.0  ;;  %v375_v9 = vmax.f32 %v202_v43, %v371_v18  ;;  %v694_v54 = vsel %vm692_vm6, %v693_v6, %v691_v55  ;;  %vm524_vm8 = vcmp.eq.f32.partialorder %v1422_v51, inf }
  0xff   :  { %v537_v14 = vsub.f32 1.0, %v521_v27  ;;  %v709_v21 = vsub.f32 1.0, %v687_v7  ;;  %v523_v57 = vmul.f32 %v922_v23, %v1422_v51  ;;  %vm526_vm9 = vcmp.eq.f32.partialorder %v1422_v51, 0.0 }
 0x100   :  { %v924_v49 = vpop.eup %923  ;;  %v366_v19 = vsub.f32 1.0, %v362_v8  ;;  %v369_v26 = vmax.f32 %v365_v48, 0.0  ;;  %v527_v28 = vand.u32 2147483648, %v1422_v51  ;;  %vm531_vm10 = vcmp.eq.f32.partialorder %v1430_v60, inf }
 0x101   :  { %v540_v0 = vmax.f32 %v536_v40, 0.0  ;;  %v710_v33 = vsub.f32 1.0, %v694_v54  ;;  %v525_v32 = vsel %vm524_vm8, %v1422_v51, %v523_v57  ;;  %v530_v11 = vmul.f32 %v924_v49, %v1430_v60 }
 0x102   :  { %v926_v38 = vpop.eup %925  ;;  %v528_v63 = vsel %vm526_vm9, %v527_v28, %v525_v32  ;;  %vm533_vm11 = vcmp.eq.f32.partialorder %v1430_v60, 0.0  ;;  %v534_v34 = vand.u32 2147483648, %v1430_v60  ;;  %vm697_vm12 = vcmp.eq.f32.partialorder %v1438_v41, inf }
 0x103   :  { %v541_v37 = vmax.f32 %v537_v14, 0.0  ;;  %v713_v43 = vmax.f32 %v709_v21, 0.0  ;;  %v532_v44 = vsel %vm531_vm10, %v1430_v60, %v530_v11  ;;  %v538_v39 = vsub.f32 1.0, %v528_v63 }
 0x104   :  { %v370_v51 = vmax.f32 %v366_v19, 0.0  ;;  %v535_v31 = vsel %vm533_vm11, %v534_v34, %v532_v44  ;;  %v696_v62 = vmul.f32 %v926_v38, %v1438_v41  ;;  %v700_v50 = vand.u32 2147483648, %v1438_v41 }
 0x105   :  { %v544_v47 = vmin.f32 %v540_v0, 1.0  ;;  %v714_v1 = vmax.f32 %v710_v33, 0.0  ;;  %v539_v16 = vsub.f32 1.0, %v535_v31  ;;  %v542_v18 = vmax.f32 %v538_v39, 0.0 }
 0x106   :  { %v376_v56 = vmax.f32 %v1432_v61, %v372_v12  ;;  %v373_v36 = vmin.f32 %v369_v26, 1.0  ;;  %v698_v20 = vsel %vm697_vm12, %v1438_v41, %v696_v62  ;;  %vm699_vm13 = vcmp.eq.f32.partialorder %v1438_v41, 0.0 }
 0x107   :  { %v928_v60 = vpop.eup %927  ;;  %v545_v24 = vmin.f32 %v541_v37, 1.0  ;;  %v717_v29 = vmin.f32 %v713_v43, 1.0  ;;  %v543_v42 = vmax.f32 %v539_v16, 0.0  ;;  %v701_v13 = vsel %vm699_vm13, %v700_v50, %v698_v20 }
 0x108   :  { %v374_v2 = vmin.f32 %v370_v51, 1.0  ;;  %v546_v17 = vmin.f32 %v542_v18, 1.0  ;;  %v703_v30 = vmul.f32 %v928_v60, %v1441_v53  ;;  %v711_v58 = vsub.f32 1.0, %v701_v13 }
 0x109   :  { %v548_v61 = vmax.f32 %v375_v9, %v544_v47  ;;  %v718_v15 = vmin.f32 %v714_v1, 1.0  ;;  %vm704_vm14 = vcmp.eq.f32.partialorder %v1441_v53, inf  ;;  %v707_v59 = vand.u32 2147483648, %v1441_v53  ;;  %v755_v9 = vpop.permute.xlu1 %754 }
 0x10a   :  { %v377_v41 = vmax.f32 %v1427_v3, %v373_v36  ;;  %v705_v52 = vsel %vm704_vm14, %v1441_v53, %v703_v30  ;;  %vm706_vm15 = vcmp.eq.f32.partialorder %v1441_v53, 0.0  ;;  %v715_v46 = vmax.f32 %v711_v58, 0.0  ;;  %v735_v3 = vpop.permute.xlu0 %734 }
 0x10b   :  { %v549_v5 = vmax.f32 %v376_v56, %v545_v24  ;;  %v721_v6 = vmax.f32 %v548_v61, %v717_v29  ;;  %v547_v22 = vmin.f32 %v543_v42, 1.0  ;;  %v708_v27 = vsel %vm706_vm15, %v707_v59, %v705_v52 }
 0x10c   :  { %v550_v7 = vmax.f32 %v377_v41, %v546_v17  ;;  %v712_v48 = vsub.f32 1.0, %v708_v27  ;;  %v719_v40 = vmin.f32 %v715_v46, 1.0  ;;  %v378_v8 = vmax.f32 %v1434_v25, %v374_v2 }
 0x10d   :  { %v722_v55 = vmax.f32 %v549_v5, %v718_v15  ;;  %vm774_vm0 = vcmask 1041408   ;;  %v766_v54 = vmul.f32 %v1502_v10, %v721_v6  ;;  %v770_v53 = vmul.f32 %v755_v9, %v721_v6 }
 0x10e   :  { %v716_v23 = vmax.f32 %v712_v48, 0.0  ;;  %v723_v12 = vmax.f32 %v550_v7, %v719_v40  ;;  %v551_v14 = vmax.f32 %v378_v8, %v547_v22  ;;  %v762_v21 = vmul.f32 %v735_v3, %v721_v6 }
 0x10f   :  { %v767_v28 = vmul.f32 %v1502_v10, %v722_v55  ;;  %v771_v38 = vmul.f32 %v755_v9, %v722_v55  ;;  %v763_v39 = vmul.f32 %v735_v3, %v722_v55  ;;  %vm833_vm1 = vcmask 1041409  }
 0x110   :  { %v720_v57 = vmin.f32 %v716_v23, 1.0  ;;  %v768_v49 = vmul.f32 %v1507_v35, %v723_v12  ;;  %v772_v19 = vmul.f32 %v760_v4, %v723_v12  ;;  %v764_v26 = vmul.f32 %v740_v45, %v723_v12 }
 0x111   :  { %vm835_vm2 = vcmask 1045509   ;;  %vm838_vm3 = vcmask 1042434   ;;  %vm840_vm4 = vcmask 1046534  }
 0x112   :  { %v724_v0 = vmax.f32 %v551_v14, %v720_v57  ;;  %v791_v25 = vsel %vm774_vm0, %v768_v49, -inf  ;;  %v807_v33 = vsel %vm774_vm0, %v772_v19, -inf  ;;  %v775_v32 = vsel %vm774_vm0, %v764_v26, -inf }
 0x113   :  { %v792_v11 = vmax.f32 %v766_v54, %v791_v25  ;;  %v808_v63 = vmax.f32 %v770_v53, %v807_v33  ;;  %v776_v34 = vmax.f32 %v762_v21, %v775_v32 }
 0x114   :  { %v769_v37 = vmul.f32 %v1507_v35, %v724_v0  ;;  %v773_v43 = vmul.f32 %v760_v4, %v724_v0  ;;  %v765_v44 = vmul.f32 %v740_v45, %v724_v0 }
 0x115   :  { %v793_v51 = vrot.slane %v792_v11, 4  ;;  %v809_v31 = vrot.slane %v808_v63, 4  ;;  %v777_v62 = vrot.slane %v776_v34, 4 }
 0x116   :  { %v799_v10 = vsel %vm774_vm0, %v769_v37, -inf  ;;  %v815_v50 = vsel %vm774_vm0, %v773_v43, -inf  ;;  %v783_v47 = vsel %vm774_vm0, %v765_v44, -inf }
 0x117   :  { %v794_v1 = vmax.f32 %v792_v11, %v793_v51  ;;  %v800_v16 = vmax.f32 %v767_v28, %v799_v10  ;;  %v810_v18 = vmax.f32 %v808_v63, %v809_v31  ;;  %v816_v56 = vmax.f32 %v771_v38, %v815_v50 }
 0x118   :  { %v778_v36 = vmax.f32 %v776_v34, %v777_v62  ;;  %v784_v20 = vmax.f32 %v763_v39, %v783_v47 }
 0x119   :  { %v795_v60 = vrot.slane %v794_v1, 2  ;;  %v801_v35 = vrot.slane %v800_v16, 4  ;;  %v811_v24 = vrot.slane %v810_v18, 2  ;;  %v817_v29 = vrot.slane %v816_v56, 4 }
 0x11a   :  { %v779_v42 = vrot.slane %v778_v36, 2  ;;  %v785_v13 = vrot.slane %v784_v20, 4 }
 0x11b   :  { %v796_v2 = vmax.f32 %v794_v1, %v795_v60  ;;  %v802_v17 = vmax.f32 %v800_v16, %v801_v35  ;;  %v812_v30 = vmax.f32 %v810_v18, %v811_v24  ;;  %v818_v58 = vmax.f32 %v816_v56, %v817_v29 }
 0x11c   :  { %v780_v4 = vmax.f32 %v778_v36, %v779_v42  ;;  %v786_v45 = vmax.f32 %v784_v20, %v785_v13 }
 0x11d   :  { %v797_v61 = vrot.slane %v796_v2, 1  ;;  %v803_v15 = vrot.slane %v802_v17, 2  ;;  %v813_v59 = vrot.slane %v812_v30, 1  ;;  %v819_v41 = vrot.slane %v818_v58, 2 }
 0x11e   :  { %v781_v52 = vrot.slane %v780_v4, 1  ;;  %v787_v46 = vrot.slane %v786_v45, 2 }
 0x11f   :  { %v804_v5 = vmax.f32 %v802_v17, %v803_v15  ;;  %v820_v6 = vmax.f32 %v818_v58, %v819_v41  ;;  %v798_v27 = vmax.f32 %v796_v2, %v797_v61  ;;  %v814_v48 = vmax.f32 %v812_v30, %v813_v59 }
 0x120   :  { %v788_v22 = vmax.f32 %v786_v45, %v787_v46  ;;  %v782_v55 = vmax.f32 %v780_v4, %v781_v52 }
 0x121   :  { %v805_v7 = vrot.slane %v804_v5, 1  ;;  %v821_v40 = vrot.slane %v820_v6, 1 }
 0x122   :  { %v789_v8 = vrot.slane %v788_v22, 1 }
 0x123   :  { %v806_v23 = vmax.f32 %v804_v5, %v805_v7  ;;  %v822_v12 = vmax.f32 %v820_v6, %v821_v40 }
 0x124   :  { %v790_v9 = vmax.f32 %v788_v22, %v789_v8 }
 0x125   :  { %v830_v3 = vcombine.low %v798_v27, %v806_v23  ;;  %v831_v54 = vcombine.low %v814_v48, %v822_v12 }
 0x126   :  { %v829_v14 = vcombine.low %v782_v55, %v790_v9 }
 0x127   :  { %v832_v53 = vrot.slane %v830_v3, 7  ;;  %v837_v21 = vrot.slane %v831_v54, 6 }
 0x129   :  { %v834_v57 = vsel %vm833_vm1, %v832_v53, %v829_v14 }
 0x12a   :  { %v836_v49 = vsel %vm835_vm2, %v832_v53, %v834_v57 }
 0x12b   :  { %v839_v19 = vsel %vm838_vm3, %v837_v21, %v836_v49 }
 0x12c   :  { %v841_v26 = vsel %vm840_vm4, %v837_v21, %v839_v19 }
 0x12d   :  { %843 = vst [vmem:[%s1538_s1] sm:$0x77] %v841_v26 }

</bundles_post_ra>
